<compile_context>
chip_gen: v6e
topology: v6e:2x2x1
jax: 0.10.0
libtpu: 0.0.40
codegen_flags: <defaults>
</compile_context>

<pallas_src>
import jax
import jax.numpy as jnp
from jax.experimental import pallas as pl
from jax.experimental.pallas import tpu as pltpu


# ----------------------------------------------------------------------------
# Small static helpers
# ----------------------------------------------------------------------------
def _round_up(n, m):
    return ((n + m - 1) // m) * m


def _pad128(n):
    return _round_up(n, 128)


def _choose_batch_tile(b_rows, m):
    """Batch tile: multiple of 8, <= 256 rows, and the double-buffered X tile
    stays under ~8 MiB so the kernel fits v7x's 64 MiB VMEM (32 MiB scoped
    default) as well as v5e/v6e."""
    tb = max(8, (min(b_rows, 256) // 8) * 8)
    budget = 8 << 20
    while tb > 8 and tb * m * 4 * 2 > budget:
        tb = max(8, (tb // 2 // 8) * 8)
    return tb


# ----------------------------------------------------------------------------
# Kernel: collapsed set layers + (BN-folded) MLP classifier
# ----------------------------------------------------------------------------
def _deepset_mlp_kernel(x_ref, vec_ref, w1_ref, w2_ref, w3_ref, out_ref):
    # Static dims (known at trace time from the ref shapes).
    h1_dim = w1_ref.shape[0]      # hidden_size_1
    p2 = w1_ref.shape[1]          # 2 * predlast_hidden_size
    p = w2_ref.shape[1]           # predlast_hidden_size
    out_pad = w3_ref.shape[1]     # out_classes padded to 128 lanes

    # Static offsets of the packed (1, H) vectors inside vec_ref
    # (each segment is 128-lane aligned; layout must match the wrapper).
    o_v0 = 0
    o_c0 = o_v0 + _pad128(h1_dim)
    o_b1 = o_c0 + _pad128(h1_dim)
    o_b2 = o_b1 + _pad128(p2)
    o_b3 = o_b2 + _pad128(p)

    x = x_ref[...]                                        # (tb, M) f32
    x_mean = jnp.mean(x, axis=1, keepdims=True)           # (tb, 1)

    # Collapsed EquivLinear(1,H0) -> mean -> InvLinear(H0,H1)  (exact rewrite).
    h1 = (x_mean * vec_ref[:, o_v0:o_v0 + h1_dim]
          + vec_ref[:, o_c0:o_c0 + h1_dim])               # (tb, H1)

    # Linear + folded eval-mode BN + ReLU   (Dropout is identity at inference).
    a1 = jnp.dot(h1, w1_ref[...], preferred_element_type=jnp.float32)
    a1 = jnp.maximum(a1 + vec_ref[:, o_b1:o_b1 + p2], 0.0)

    a2 = jnp.dot(a1, w2_ref[...], preferred_element_type=jnp.float32)
    a2 = jnp.maximum(a2 + vec_ref[:, o_b2:o_b2 + p], 0.0)

    out_ref[...] = (jnp.dot(a2, w3_ref[...], preferred_element_type=jnp.float32)
                    + vec_ref[:, o_b3:o_b3 + out_pad])


# ----------------------------------------------------------------------------
# Parameter construction (deterministic, in-script) — original parameterization
# ----------------------------------------------------------------------------
def init_params(key, hidden_size_0, hidden_size_1, predlast_hidden_size, out_classes):
    ks = jax.random.split(key, 16)
    P2 = 2 * predlast_hidden_size
    P = predlast_hidden_size

    def w(k, shape, scale=0.1):
        return (scale * jax.random.normal(k, shape)).astype(jnp.float32)

    return dict(
        # EquivLinear(1, H0)
        alpha_e=w(ks[0], (1, hidden_size_0)),
        beta_e=w(ks[1], (1, hidden_size_0)),
        bias_e=w(ks[2], (1, hidden_size_0)),
        # InvLinear(H0, H1)
        beta_i=w(ks[3], (hidden_size_0, hidden_size_1)),
        bias_i=w(ks[4], (1, hidden_size_1)),
        # Linear(H1, 2P) + BatchNorm1d(2P) (eval-mode running stats)
        w1=w(ks[5], (hidden_size_1, P2)),
        b1=w(ks[6], (1, P2)),
        g1=jnp.ones((1, P2), jnp.float32),
        bb1=jnp.zeros((1, P2), jnp.float32),
        rm1=jnp.zeros((1, P2), jnp.float32),
        rv1=jnp.ones((1, P2), jnp.float32),
        # Linear(2P, P) + BatchNorm1d(P)
        w2=w(ks[7], (P2, P)),
        b2=w(ks[8], (1, P)),
        g2=jnp.ones((1, P), jnp.float32),
        bb2=jnp.zeros((1, P), jnp.float32),
        rm2=jnp.zeros((1, P), jnp.float32),
        rv2=jnp.ones((1, P), jnp.float32),
        # Linear(P, out_classes)
        w3=w(ks[9], (P, out_classes)),
        b3=w(ks[10], (1, out_classes)),
    )


# ----------------------------------------------------------------------------
# Wrapper: exact folding + packing + batch-tiled pallas_call
# ----------------------------------------------------------------------------
@jax.jit
def deepset_forward(X, y, params):
    # y (meta features) is accepted but unused, exactly like the PyTorch forward.
    del y
    eps = 1e-5
    B = X.shape[0]
    x = X.reshape(B, -1).astype(jnp.float32)               # (B, M), M = I*F
    M = x.shape[1]

    # ---- Exact collapse of EquivLinear(1,H0) -> mean -> InvLinear(H0,H1) ----
    # mean_m(x[b,m]*alpha + (x_mean[b]*beta + bias)) = x_mean*(alpha+beta) + bias
    v0 = (params["alpha_e"] + params["beta_e"]) @ params["beta_i"]      # (1, H1)
    c0 = params["bias_e"] @ params["beta_i"] + params["bias_i"]         # (1, H1)

    # ---- Fold eval-mode BatchNorm into the preceding Linear layers ---------
    s1 = params["g1"] * jax.lax.rsqrt(params["rv1"] + eps)              # (1, 2P)
    w1 = params["w1"] * s1
    b1 = (params["b1"] - params["rm1"]) * s1 + params["bb1"]
    s2 = params["g2"] * jax.lax.rsqrt(params["rv2"] + eps)              # (1, P)
    w2 = params["w2"] * s2
    b2 = (params["b2"] - params["rm2"]) * s2 + params["bb2"]

    # ---- Lane-dense output: pad w3 / b3 / out to 128 columns ----------------
    out_classes = params["w3"].shape[1]
    out_pad = _pad128(out_classes)
    w3 = jnp.pad(params["w3"], ((0, 0), (0, out_pad - out_classes)))
    b3 = jnp.pad(params["b3"], ((0, 0), (0, out_pad - out_classes)))

    # ---- Pack all (1, H) row vectors into one 128-aligned slab (single DMA) --
    h1_dim = v0.shape[1]
    p2 = w1.shape[1]
    p = w2.shape[1]

    def seg(v, width):
        return jnp.pad(v, ((0, 0), (0, width - v.shape[1])))

    vec = jnp.concatenate(
        [seg(v0, _pad128(h1_dim)), seg(c0, _pad128(h1_dim)),
         seg(b1, _pad128(p2)), seg(b2, _pad128(p)), b3], axis=1)        # (1, TOTAL)
    total = vec.shape[1]

    # ---- Batch tiling: X streams through VMEM, weights stay resident --------
    b8 = _round_up(B, 8)
    tb = _choose_batch_tile(b8, M)
    b_pad = _round_up(b8, tb)
    if b_pad != B:
        x = jnp.pad(x, ((0, b_pad - B), (0, 0)))

    out = pl.pallas_call(
        _deepset_mlp_kernel,
        out_shape=jax.ShapeDtypeStruct((b_pad, out_pad), jnp.float32),
        grid_spec=pltpu.PrefetchScalarGridSpec(
            num_scalar_prefetch=0,
            grid=(b_pad // tb,),
            in_specs=[
                pl.BlockSpec((tb, M), lambda i: (i, 0)),       # X: streamed per tile
                pl.BlockSpec((1, total), lambda i: (0, 0)),    # packed row vectors
                pl.BlockSpec((h1_dim, p2), lambda i: (0, 0)),  # w1 (BN folded)
                pl.BlockSpec((p2, p), lambda i: (0, 0)),       # w2 (BN folded)
                pl.BlockSpec((p, out_pad), lambda i: (0, 0)),  # w3 (lane padded)
            ],
            out_specs=pl.BlockSpec((tb, out_pad), lambda i: (i, 0)),
        ),
        compiler_params=pltpu.CompilerParams(
            dimension_semantics=("parallel",)),
    )(x, vec, w1, w2, w3)

    return out[:B, :out_classes]


# ----------------------------------------------------------------------------
# Pure-JAX reference (original, un-folded math) for a sanity check
# ----------------------------------------------------------------------------
def reference_forward(X, params):
    eps = 1e-5
    B = X.shape[0]
    x = X.reshape(B, -1, 1).astype(jnp.float32)             # (B, M, 1)
    h_inv = jnp.mean(x, axis=1) @ params["beta_e"] + params["bias_e"]
    y_eq = x @ params["alpha_e"] + h_inv[:, None, :]         # EquivLinear(1,H0)
    h1 = jnp.mean(y_eq, axis=1) @ params["beta_i"] + params["bias_i"]  # InvLinear
    a1 = h1 @ params["w1"] + params["b1"]
    a1 = (a1 - params["rm1"]) * (params["g1"] / jnp.sqrt(params["rv1"] + eps)) + params["bb1"]
    a1 = jnp.maximum(a1, 0.0)
    a2 = a1 @ params["w2"] + params["b2"]
    a2 = (a2 - params["rm2"]) * (params["g2"] / jnp.sqrt(params["rv2"] + eps)) + params["bb2"]
    a2 = jnp.maximum(a2, 0.0)
    return a2 @ params["w3"] + params["b3"]


if __name__ == "__main__":
    # Small shapes consistent with the module's forward.
    B, INSTANCES, FEATURES = 8, 8, 4        # -> set size M = 32, in_features = 1
    H0, H1, PRED, OUT, META = 32, 64, 64, 3, 27

    key = jax.random.PRNGKey(0)
    kx, ky, kp = jax.random.split(key, 3)
    X = jax.random.normal(kx, (B, INSTANCES, FEATURES), dtype=jnp.float32)
    y = jax.random.normal(ky, (B, META), dtype=jnp.float32)   # meta features (unused)
    params = init_params(kp, H0, H1, PRED, OUT)

    out = jax.block_until_ready(deepset_forward(X, y, params))

    ref = reference_forward(X, params)
    assert out.shape == (B, OUT)
    assert jnp.allclose(out, ref, atol=1e-4, rtol=1e-4), "mismatch vs reference"

    print("KERNEL_OK")
</pallas_src>

<mosaic_0001>
module attributes {stable_mosaic.version = 11 : i64} {
  func.func @_deepset_mlp_kernel(%arg0: i32, %arg1: memref<8x32xf32, #tpu.memory_space<vmem>>, %arg2: memref<1x640xf32, #tpu.memory_space<vmem>>, %arg3: memref<64x128xf32, #tpu.memory_space<vmem>>, %arg4: memref<128x64xf32, #tpu.memory_space<vmem>>, %arg5: memref<64x128xf32, #tpu.memory_space<vmem>>, %arg6: memref<8x128xf32, #tpu.memory_space<vmem>>) attributes {dimension_semantics = [#tpu.dimension_semantics<parallel>], iteration_bounds = array<i64: 1>, scalar_prefetch = 0 : i64, scratch_operands = 0 : i64, tpu.core_type = #tpu.core_type<tc>, window_params = [{transform_indices = @transform_0, window_bounds = array<i64: 8, 32>}, {pipeline_mode = #tpu.pipeline_mode<synchronous>, transform_indices = @transform_1, window_bounds = array<i64: 1, 640>}, {pipeline_mode = #tpu.pipeline_mode<synchronous>, transform_indices = @transform_2, window_bounds = array<i64: 64, 128>}, {pipeline_mode = #tpu.pipeline_mode<synchronous>, transform_indices = @transform_3, window_bounds = array<i64: 128, 64>}, {pipeline_mode = #tpu.pipeline_mode<synchronous>, transform_indices = @transform_4, window_bounds = array<i64: 64, 128>}, {transform_indices = @transform_5, window_bounds = array<i64: 8, 128>}]} {
    %c0 = arith.constant 0 : index
    %c0_0 = arith.constant 0 : index
    %0 = vector.load %arg1[%c0, %c0_0] : memref<8x32xf32, #tpu.memory_space<vmem>>, vector<8x32xf32>
    %cst = arith.constant dense<0.000000e+00> : vector<8xf32>
    %1 = vector.multi_reduction <add>, %0, %cst [1] : vector<8x32xf32> to vector<8xf32>
    %2 = vector.shape_cast %1 : vector<8xf32> to vector<8x1xf32>
    %cst_1 = arith.constant 3.200000e+01 : f32
    %3 = vector.broadcast %cst_1 : f32 to vector<8x1xf32>
    %4 = arith.divf %2, %3 : vector<8x1xf32>
    %c0_2 = arith.constant 0 : index
    %c0_3 = arith.constant 0 : index
    %5 = vector.load %arg2[%c0_2, %c0_3] : memref<1x640xf32, #tpu.memory_space<vmem>>, vector<1x64xf32>
    %6 = vector.broadcast %4 : vector<8x1xf32> to vector<8x64xf32>
    %7 = vector.broadcast %5 : vector<1x64xf32> to vector<8x64xf32>
    %8 = arith.mulf %6, %7 : vector<8x64xf32>
    %c0_4 = arith.constant 0 : index
    %c128 = arith.constant 128 : index
    %9 = vector.load %arg2[%c0_4, %c128] : memref<1x640xf32, #tpu.memory_space<vmem>>, vector<1x64xf32>
    %10 = vector.broadcast %9 : vector<1x64xf32> to vector<8x64xf32>
    %11 = arith.addf %8, %10 : vector<8x64xf32>
    %c0_5 = arith.constant 0 : index
    %c0_6 = arith.constant 0 : index
    %12 = vector.load %arg3[%c0_5, %c0_6] : memref<64x128xf32, #tpu.memory_space<vmem>>, vector<64x128xf32>
    %cst_7 = arith.constant dense<0.000000e+00> : vector<8x128xf32>
    %13 = tpu.matmul %11, %12, %cst_7 {dimension_numbers = #tpu.dot_dimension_numbers<[1], [0], [0], [1], [0, 0, 1, 1], [], []>} : vector<8x64xf32>, vector<64x128xf32>, vector<8x128xf32> -> vector<8x128xf32>
    %c0_8 = arith.constant 0 : index
    %c256 = arith.constant 256 : index
    %14 = vector.load %arg2[%c0_8, %c256] : memref<1x640xf32, #tpu.memory_space<vmem>>, vector<1x128xf32>
    %15 = vector.broadcast %14 : vector<1x128xf32> to vector<8x128xf32>
    %16 = arith.addf %13, %15 : vector<8x128xf32>
    %cst_9 = arith.constant 0.000000e+00 : f32
    %17 = vector.broadcast %cst_9 : f32 to vector<8x128xf32>
    %18 = arith.maximumf %16, %17 : vector<8x128xf32>
    %c0_10 = arith.constant 0 : index
    %c0_11 = arith.constant 0 : index
    %19 = vector.load %arg4[%c0_10, %c0_11] : memref<128x64xf32, #tpu.memory_space<vmem>>, vector<128x64xf32>
    %cst_12 = arith.constant dense<0.000000e+00> : vector<8x64xf32>
    %20 = tpu.matmul %18, %19, %cst_12 {dimension_numbers = #tpu.dot_dimension_numbers<[1], [0], [0], [1], [0, 0, 1, 1], [], []>} : vector<8x128xf32>, vector<128x64xf32>, vector<8x64xf32> -> vector<8x64xf32>
    %c0_13 = arith.constant 0 : index
    %c384 = arith.constant 384 : index
    %21 = vector.load %arg2[%c0_13, %c384] : memref<1x640xf32, #tpu.memory_space<vmem>>, vector<1x64xf32>
    %22 = vector.broadcast %21 : vector<1x64xf32> to vector<8x64xf32>
    %23 = arith.addf %20, %22 : vector<8x64xf32>
    %cst_14 = arith.constant 0.000000e+00 : f32
    %24 = vector.broadcast %cst_14 : f32 to vector<8x64xf32>
    %25 = arith.maximumf %23, %24 : vector<8x64xf32>
    %c0_15 = arith.constant 0 : index
    %c0_16 = arith.constant 0 : index
    %26 = vector.load %arg5[%c0_15, %c0_16] : memref<64x128xf32, #tpu.memory_space<vmem>>, vector<64x128xf32>
    %cst_17 = arith.constant dense<0.000000e+00> : vector<8x128xf32>
    %27 = tpu.matmul %25, %26, %cst_17 {dimension_numbers = #tpu.dot_dimension_numbers<[1], [0], [0], [1], [0, 0, 1, 1], [], []>} : vector<8x64xf32>, vector<64x128xf32>, vector<8x128xf32> -> vector<8x128xf32>
    %c0_18 = arith.constant 0 : index
    %c512 = arith.constant 512 : index
    %28 = vector.load %arg2[%c0_18, %c512] : memref<1x640xf32, #tpu.memory_space<vmem>>, vector<1x128xf32>
    %29 = vector.broadcast %28 : vector<1x128xf32> to vector<8x128xf32>
    %30 = arith.addf %27, %29 : vector<8x128xf32>
    %c0_19 = arith.constant 0 : index
    %c0_20 = arith.constant 0 : index
    %31 = vector.load %arg6[%c0_19, %c0_20] : memref<8x128xf32, #tpu.memory_space<vmem>>, vector<8x128xf32>
    tpu.vector_store %arg6[%c0_19, %c0_20], %30 {strides = array<i32>} : memref<8x128xf32, #tpu.memory_space<vmem>>, vector<8x128xf32>,
    return
  }
  func.func @transform_0(%arg0: i32) -> (i32, i32) {
    %c0_i32 = arith.constant 0 : i32
    %c0_i32_0 = arith.constant 0 : i32
    return %arg0, %c0_i32 : i32, i32
  }
  func.func @transform_1(%arg0: i32) -> (i32, i32) {
    %c0_i32 = arith.constant 0 : i32
    %c0_i32_0 = arith.constant 0 : i32
    %c0_i32_1 = arith.constant 0 : i32
    return %c0_i32, %c0_i32_0 : i32, i32
  }
  func.func @transform_2(%arg0: i32) -> (i32, i32) {
    %c0_i32 = arith.constant 0 : i32
    %c0_i32_0 = arith.constant 0 : i32
    %c0_i32_1 = arith.constant 0 : i32
    return %c0_i32, %c0_i32_0 : i32, i32
  }
  func.func @transform_3(%arg0: i32) -> (i32, i32) {
    %c0_i32 = arith.constant 0 : i32
    %c0_i32_0 = arith.constant 0 : i32
    %c0_i32_1 = arith.constant 0 : i32
    return %c0_i32, %c0_i32_0 : i32, i32
  }
  func.func @transform_4(%arg0: i32) -> (i32, i32) {
    %c0_i32 = arith.constant 0 : i32
    %c0_i32_0 = arith.constant 0 : i32
    %c0_i32_1 = arith.constant 0 : i32
    return %c0_i32, %c0_i32_0 : i32, i32
  }
  func.func @transform_5(%arg0: i32) -> (i32, i32) {
    %c0_i32 = arith.constant 0 : i32
    %c0_i32_0 = arith.constant 0 : i32
    return %arg0, %c0_i32 : i32, i32
  }
}

</mosaic_0001>

<bundles_post_ra>
// kernel: deepset_forward.1
= control target key start
LH: loop header
LB: loop body
LE: loop exit
PB: predicated region body
PF: predicated region fallthrough
CT: control target
= control target key end

     0   :  { %vm21_vm0 = vcmask 261120   ;;  %v437_v1 = vmov 0.0   ;;  %vm438_vm1 = vmmov 0   ;;  %vm58_vm2 = vcmask 523264   ;;  %s626_s0 = inlined_call_operand.vmem [shape: f32[8,32], index: 0, kind: input, shape index: {}]   ;;  %s627_s2 = inlined_call_operand.vmem [shape: f32[64,128], index: 2, kind: input, shape index: {}]   ;;  %s628_s3 = inlined_call_operand.vmem [shape: f32[128,64], index: 3, kind: input, shape index: {}]   ;;  %s629_s1 = inlined_call_operand.vmem [shape: f32[1,640], index: 1, kind: input, shape index: {}]   ;;  %s630_s4 = inlined_call_operand.vmem [shape: f32[64,128], index: 4, kind: input, shape index: {}]   ;;  %s631_s5 = inlined_call_operand.vmem [shape: f32[8,128], index: 5, kind: output, shape index: {}]  }
   0x1   :  { %v20_v0 = vld [vmem:[%s626_s0] sm:$0xff]  ;;  %362 = vmatprep.subr.mxu0 %v437_v1  ;;  %v50_v2 = vld [vmem:[%s627_s2 + $0x38] sm:$0xff]  ;;  %v49_v3 = vld [vmem:[%s627_s2 + $0x30] sm:$0xff]  ;;  %381 = vmatprep.subr.mxu1 %v437_v1 }
   0x2   :  { %v22_v4 = vsel %vm21_vm0, %v20_v0, 0.0  ;;  %363 = vmatpush3.msra.mxu0 %v50_v2  ;;  %v48_v5 = vld [vmem:[%s627_s2 + $0x28] sm:$0xff]  ;;  %v47_v6 = vld [vmem:[%s627_s2 + $0x20] sm:$0xff]  ;;  %v46_v7 = vld [vmem:[%s627_s2 + $0x18] sm:$0xff]  ;;  %378 = vmatprep.mubr.msk.f32.mxu0 %vm438_vm1, %v437_v1 }
   0x3   :  { %23 = vadd.xlane.f32.xlu0 %v22_v4  ;;  %364 = vmatprep.subr.mxu0 %v437_v1  ;;  %v45_v8 = vld [vmem:[%s627_s2 + $0x10] sm:$0xff]  ;;  %v44_v9 = vld [vmem:[%s627_s2 + $0x8] sm:$0xff]  ;;  %v43_v10 = vld [vmem:[%s627_s2] sm:$0xff] }
   0x4   :  { %365 = vmatpush3.msra.mxu0 %v49_v3  ;;  %413 = vmatprep.mubr.msk.f32.mxu1 %vm438_vm1, %v437_v1  ;;  %v148_v11 = vld [vmem:[%s628_s3 + $0x78] sm:$0xff]  ;;  %v147_v12 = vld [vmem:[%s628_s3 + $0x70] sm:$0xff]  ;;  %v146_v13 = vld [vmem:[%s628_s3 + $0x68] sm:$0xff] }
   0x5   :  { %366 = vmatprep.subr.mxu0 %v437_v1  ;;  %382 = vmatpush3.msra.mxu1 %v148_v11  ;;  %v145_v14 = vld [vmem:[%s628_s3 + $0x60] sm:$0xff]  ;;  %v144_v15 = vld [vmem:[%s628_s3 + $0x58] sm:$0xff]  ;;  %v143_v16 = vld [vmem:[%s628_s3 + $0x50] sm:$0xff] }
   0x6   :  { %367 = vmatpush3.msra.mxu0 %v48_v5  ;;  %383 = vmatprep.subr.mxu1 %v437_v1  ;;  %v142_v17 = vld [vmem:[%s628_s3 + $0x48] sm:$0xff]  ;;  %v141_v18 = vld [vmem:[%s628_s3 + $0x40] sm:$0xff]  ;;  %v140_v19 = vld [vmem:[%s628_s3 + $0x38] sm:$0xff] }
   0x7   :  { %368 = vmatprep.subr.mxu0 %v437_v1  ;;  %384 = vmatpush3.msra.mxu1 %v147_v12  ;;  %v139_v20 = vld [vmem:[%s628_s3 + $0x30] sm:$0xff]  ;;  %v138_v21 = vld [vmem:[%s628_s3 + $0x28] sm:$0xff]  ;;  %v137_v22 = vld [vmem:[%s628_s3 + $0x20] sm:$0xff] }
   0x8   :  { %369 = vmatpush3.msra.mxu0 %v47_v6  ;;  %385 = vmatprep.subr.mxu1 %v437_v1  ;;  %v136_v23 = vld [vmem:[%s628_s3 + $0x18] sm:$0xff]  ;;  %v320_v25 = vld [vmem:[%s629_s1] ss:$0 sm:$0xff]  ;;  %v321_v27 = vld [vmem:[%s629_s1 + $0x1] ss:$0 sm:$0xff] }
   0x9   :  { %370 = vmatprep.subr.mxu0 %v437_v1  ;;  %386 = vmatpush3.msra.mxu1 %v146_v13  ;;  %v135_v30 = vld [vmem:[%s628_s3 + $0x10] sm:$0xff]  ;;  %v134_v31 = vld [vmem:[%s628_s3 + $0x8] sm:$0xff]  ;;  %v133_v32 = vld [vmem:[%s628_s3] sm:$0xff] }
   0xa   :  { %371 = vmatpush3.msra.mxu0 %v46_v7  ;;  %387 = vmatprep.subr.mxu1 %v437_v1  ;;  %v234_v33 = vld [vmem:[%s630_s4 + $0x38] sm:$0xff]  ;;  %v233_v34 = vld [vmem:[%s630_s4 + $0x30] sm:$0xff]  ;;  %v232_v35 = vld [vmem:[%s630_s4 + $0x28] sm:$0xff] }
   0xb   :  { %372 = vmatprep.subr.mxu0 %v437_v1  ;;  %388 = vmatpush3.msra.mxu1 %v145_v14  ;;  %v231_v36 = vld [vmem:[%s630_s4 + $0x20] sm:$0xff]  ;;  %v230_v37 = vld [vmem:[%s630_s4 + $0x18] sm:$0xff]  ;;  %v229_v43 = vld [vmem:[%s630_s4 + $0x10] sm:$0xff] }
   0xc   :  { %373 = vmatpush3.msra.mxu0 %v45_v8  ;;  %389 = vmatprep.subr.mxu1 %v437_v1  ;;  %v322_v38 = vld [vmem:[%s629_s1 + $0x2] ss:$0 sm:$0xff]  ;;  %v228_v44 = vld [vmem:[%s630_s4 + $0x8] sm:$0xff]  ;;  %v324_v46 = vld [vmem:[%s629_s1 + $0x3] ss:$0 sm:$0xff] }
   0xd   :  { %374 = vmatprep.subr.mxu0 %v437_v1  ;;  %390 = vmatpush3.msra.mxu1 %v144_v15  ;;  %v227_v45 = vld [vmem:[%s630_s4] sm:$0xff] }
   0xe   :  { %375 = vmatpush3.msra.mxu0 %v44_v9  ;;  %391 = vmatprep.subr.mxu1 %v437_v1  ;;  %v325_v51 = vld [vmem:[%s629_s1 + $0x4] ss:$0 sm:$0xff] }
   0xf   :  { %376 = vmatprep.subr.mxu0 %v437_v1  ;;  %392 = vmatpush3.msra.mxu1 %v143_v16 }
  0x10   :  { %377 = vmatpush3.msra.mxu0 %v43_v10  ;;  %393 = vmatprep.subr.mxu1 %v437_v1 }
  0x11   :  { %416 = vmatprep.subr.mxu0 %v437_v1  ;;  %394 = vmatpush3.msra.mxu1 %v142_v17 }
  0x12   :  { %395 = vmatprep.subr.mxu1 %v437_v1 }
  0x13   :  { %396 = vmatpush3.msra.mxu1 %v141_v18 }
  0x14   :  { %397 = vmatprep.subr.mxu1 %v437_v1 }
  0x15   :  { %398 = vmatpush3.msra.mxu1 %v140_v19 }
  0x16   :  { %399 = vmatprep.subr.mxu1 %v437_v1 }
  0x17   :  { %400 = vmatpush3.msra.mxu1 %v139_v20 }
  0x18   :  { %401 = vmatprep.subr.mxu1 %v437_v1 }
  0x19   :  { %402 = vmatpush3.msra.mxu1 %v138_v21 }
  0x1a   :  { %403 = vmatprep.subr.mxu1 %v437_v1 }
  0x1b   :  { %404 = vmatpush3.msra.mxu1 %v137_v22 }
  0x1c   :  { %405 = vmatprep.subr.mxu1 %v437_v1 }
  0x1d   :  { %406 = vmatpush3.msra.mxu1 %v136_v23 }
  0x1e   :  { %407 = vmatprep.subr.mxu1 %v437_v1 }
  0x1f   :  { %408 = vmatpush3.msra.mxu1 %v135_v30 }
  0x20   :  { %409 = vmatprep.subr.mxu1 %v437_v1 }
  0x21   :  { %410 = vmatpush3.msra.mxu1 %v134_v31 }
  0x22   :  { %411 = vmatprep.subr.mxu1 %v437_v1 }
  0x23   :  { %412 = vmatpush3.msra.mxu1 %v133_v32 }
  0x8c   :  { %v24_v24 = vpop.xlane.xlu0 %23 }
  0x8d   :  { %v26_v26 = vmul.f32 0.03125, %v24_v24 }
  0x8f   :  { %v34_v28 = vmul.f32 %v320_v25, %v26_v26 }
  0x91   :  { %v42_v29 = vadd.f32 %v321_v27, %v34_v28 }
  0x93   :  { %379 = vmatmul.mubr.msk.f32.vlgmr.msra.gmra.mxu0 %vm58_vm2, %v42_v29 }
  0x94   :  { %432 = vmatprep.mubr.msk.f32.mxu0 %vm438_vm1, %v437_v1  ;;  %417 = vmatpush3.msra.mxu0 %v234_v33 }
  0x95   :  { %418 = vmatprep.subr.mxu0 %v437_v1 }
  0x96   :  { %419 = vmatpush3.msra.mxu0 %v233_v34 }
  0x97   :  { %420 = vmatprep.subr.mxu0 %v437_v1 }
  0x98   :  { %421 = vmatpush3.msra.mxu0 %v232_v35 }
  0x99   :  { %422 = vmatprep.subr.mxu0 %v437_v1 }
  0x9a   :  { %423 = vmatpush3.msra.mxu0 %v231_v36 }
  0x9b   :  { %424 = vmatprep.subr.mxu0 %v437_v1 }
  0x9c   :  { %425 = vmatpush3.msra.mxu0 %v230_v37 }
  0x9d   :  { %426 = vmatprep.subr.mxu0 %v437_v1 }
  0x9e   :  { %427 = vmatpush3.msra.mxu0 %v229_v43 }
  0x9f   :  { %428 = vmatprep.subr.mxu0 %v437_v1 }
  0xa0   :  { %429 = vmatpush3.msra.mxu0 %v228_v44 }
  0xa1   :  { %430 = vmatprep.subr.mxu0 %v437_v1 }
  0xa2   :  { %431 = vmatpush3.msra.mxu0 %v227_v45 }
 0x153   :  { %v128_v39 = vpop.f32.mrf.mxu0 }
 0x154   :  { %v129_v40 = vadd.f32 %v322_v38, %v128_v39 }
 0x155   :  { %v380_v41 = vpop.f32.mrf.mxu0 }
 0x156   :  { %v132_v42 = vmax.f32 %v129_v40, 0.0 }
 0x158   :  { %414 = vmatmul.mubr.f32.vlgmr.msra.gmra.mxu1 %v132_v42 }
 0x218   :  { %v222_v47 = vpop.f32.mrf.mxu1 }
 0x219   :  { %v223_v48 = vadd.f32 %v324_v46, %v222_v47 }
 0x21a   :  { %v415_v49 = vpop.f32.mrf.mxu1 }
 0x21b   :  { %v226_v50 = vmax.f32 %v223_v48, 0.0 }
 0x21d   :  { %433 = vmatmul.mubr.msk.f32.vlgmr.msra.gmra.mxu0 %vm58_vm2, %v226_v50 }
 0x2dd   :  { %v311_v52 = vpop.f32.mrf.mxu0 }
 0x2de   :  { %v312_v53 = vadd.f32 %v325_v51, %v311_v52 }
 0x2df   :  { %v434_v54 = vpop.f32.mrf.mxu0 }
 0x2e0   :  { %315 = vst [vmem:[%s631_s5] sm:$0xff] %v312_v53 }

</bundles_post_ra>
